<compile_context>
chip_gen: v7x
topology: tpu7x:2x2x1
jax: 0.10.0
libtpu: 0.0.40
codegen_flags: <defaults>
</compile_context>

<pallas_src>
import jax
import jax.numpy as jnp
from jax.experimental import pallas as pl
from jax.experimental.pallas import tpu as pltpu


def _netE_kernel(z_ref, w1_ref, b1_ref, w2_ref, b2_ref, w3_ref, b3_ref, o_ref):
    """Fused 3-layer MLP with LeakyReLU(0.01).

    z_ref : (TB, bottleneck_factor) f32 batch tile (cast to bf16 in-kernel)
    w*    : bf16 weights (in, out); b*: f32 biases (1, out)
    o_ref : (TB, nez) f32 (unpadded; nez == full array dim)
    """
    x = z_ref[...].astype(jnp.bfloat16)

    # Layer 1: bf16 x bf16 matmul, f32 accumulate; bias + LeakyReLU in f32.
    h = jnp.dot(x, w1_ref[...], preferred_element_type=jnp.float32) + b1_ref[...]
    h = jnp.maximum(h, 0.01 * h)

    # Layer 2
    h = jnp.dot(h.astype(jnp.bfloat16), w2_ref[...],
                preferred_element_type=jnp.float32) + b2_ref[...]
    h = jnp.maximum(h, 0.01 * h)

    # Layer 3 (energy head)
    o = jnp.dot(h.astype(jnp.bfloat16), w3_ref[...],
                preferred_element_type=jnp.float32) + b3_ref[...]
    o_ref[...] = o.astype(o_ref.dtype)


def pack_params(params):
    """One-time parameter packing (hoisted out of the per-call forward path)."""
    w1, b1, w2, b2, w3, b3 = params
    return (
        w1.astype(jnp.bfloat16), b1.astype(jnp.float32).reshape(1, -1),
        w2.astype(jnp.bfloat16), b2.astype(jnp.float32).reshape(1, -1),
        w3.astype(jnp.bfloat16), b3.astype(jnp.float32).reshape(1, -1),
    )


def _pick_tile_b(B, tile_b):
    if tile_b is not None:
        if tile_b >= B:
            return B
        return max(256, (tile_b // 256) * 256)
    if B <= 256:
        # Tiny problem: one grid step; kernel is fixed-cost dominated anyway.
        return B
    # Large tiles to amortize per-step pipeline overhead, but never collapse to a single
    # step so the "parallel" grid axis can shard across both v7x TensorCores.
    return min(2048, 256 * pl.cdiv(pl.cdiv(B, 2), 256))


def netE_forward(z, packed_params, *, tile_b=None):
    """z: (B, bottleneck_factor, 1, 1) -> (B, nez, 1, 1), matching the PyTorch module."""
    w1, b1, w2, b2, w3, b3 = packed_params
    B = z.shape[0]
    bf = w1.shape[0]
    ndf = w1.shape[1]
    nez = w3.shape[1]

    # z.squeeze() in the reference: (B, bf, 1, 1) -> (B, bf). Kept f32; cast happens in-kernel.
    z2d = z.reshape(B, bf)

    tb = _pick_tile_b(B, tile_b)
    grid = pl.cdiv(B, tb)  # ragged last block handled by Pallas (no wrapper padding)

    # Full-extent blocks with constant index_map -> params stay resident in VMEM, no
    # per-step re-DMA. (Intentional; do not tile these over the grid.)
    full = lambda shape: pl.BlockSpec(shape, lambda i: (0, 0))

    grid_spec = pl.GridSpec(
        grid=(grid,),
        in_specs=[
            pl.BlockSpec((tb, bf), lambda i: (i, 0)),   # z tile
            full((bf, ndf)),    # w1
            full((1, ndf)),     # b1
            full((ndf, ndf)),   # w2
            full((1, ndf)),     # b2
            full((ndf, nez)),   # w3
            full((1, nez)),     # b3
        ],
        out_specs=pl.BlockSpec((tb, nez), lambda i: (i, 0)),
    )

    out2d = pl.pallas_call(
        _netE_kernel,
        out_shape=jax.ShapeDtypeStruct((B, nez), jnp.float32),
        grid_spec=grid_spec,
        compiler_params=pltpu.CompilerParams(
            dimension_semantics=("parallel",),
        ),
    )(z2d, w1, b1, w2, b2, w3, b3)

    # .view(-1, nez, 1, 1)
    return out2d.reshape(B, nez, 1, 1)


def init_params(key, bottleneck_factor, ndf, nez):
    """Deterministic init mimicking nn.Linear's default U(-1/sqrt(fan_in), 1/sqrt(fan_in)).

    Weights are stored as (in, out) == PyTorch weight.T."""
    k1, k2, k3, k4, k5, k6 = jax.random.split(key, 6)

    def lin(kw, kb, fan_in, fan_out):
        bound = 1.0 / jnp.sqrt(fan_in)
        w = jax.random.uniform(kw, (fan_in, fan_out), jnp.float32, -bound, bound)
        b = jax.random.uniform(kb, (1, fan_out), jnp.float32, -bound, bound)
        return w, b

    w1, b1 = lin(k1, k2, bottleneck_factor, ndf)
    w2, b2 = lin(k3, k4, ndf, ndf)
    w3, b3 = lin(k5, k6, ndf, nez)
    return (w1, b1, w2, b2, w3, b3)


def reference_forward(z, params):
    """Pure-JAX reference matching the kernel's numerics (bf16 matmuls, f32 accumulation)."""
    w1, b1, w2, b2, w3, b3 = params
    nez = w3.shape[1]
    bf16 = jnp.bfloat16
    x = z.reshape(z.shape[0], -1).astype(bf16)
    h = jnp.dot(x, w1.astype(bf16), preferred_element_type=jnp.float32) + b1
    h = jnp.maximum(h, 0.01 * h)
    h = jnp.dot(h.astype(bf16), w2.astype(bf16), preferred_element_type=jnp.float32) + b2
    h = jnp.maximum(h, 0.01 * h)
    o = jnp.dot(h.astype(bf16), w3.astype(bf16), preferred_element_type=jnp.float32) + b3
    return o.reshape(-1, nez, 1, 1)


if __name__ == "__main__":
    # Module-consistent shapes: args.bottleneck_factor = 32, args.ndf = 64, args.nez = 8
    bottleneck_factor, ndf, nez = 32, 64, 8

    key = jax.random.PRNGKey(0)
    kz1, kz2, kp = jax.random.split(key, 3)

    params = init_params(kp, bottleneck_factor, ndf, nez)
    packed = pack_params(params)  # one-time dtype prep, outside the forward path

    # Small batch: single grid step (overhead-dominated regime).
    B0 = 16
    z0 = jax.random.normal(kz1, (B0, bottleneck_factor, 1, 1), jnp.float32)
    out0 = jax.block_until_ready(netE_forward(z0, packed))
    ref0 = reference_forward(z0, params)
    assert out0.shape == (B0, nez, 1, 1), out0.shape
    assert jnp.allclose(out0, ref0, atol=1e-3, rtol=1e-3), float(jnp.max(jnp.abs(out0 - ref0)))

    # Larger batch: multi-step grid (2 tiles of 512) with a ragged last block, no padding.
    B1 = 520
    z1 = jax.random.normal(kz2, (B1, bottleneck_factor, 1, 1), jnp.float32)
    out1 = jax.block_until_ready(netE_forward(z1, packed))
    ref1 = reference_forward(z1, params)
    assert out1.shape == (B1, nez, 1, 1), out1.shape
    assert jnp.allclose(out1, ref1, atol=1e-3, rtol=1e-3), float(jnp.max(jnp.abs(out1 - ref1)))

    print("KERNEL_OK")
</pallas_src>

<mosaic_0001>
module attributes {stable_mosaic.version = 11 : i64} {
  func.func @_netE_kernel(%arg0: i32, %arg1: memref<16x32xf32, #tpu.memory_space<vmem>>, %arg2: memref<32x64xbf16, #tpu.memory_space<vmem>>, %arg3: memref<1x64xf32, #tpu.memory_space<vmem>>, %arg4: memref<64x64xbf16, #tpu.memory_space<vmem>>, %arg5: memref<1x64xf32, #tpu.memory_space<vmem>>, %arg6: memref<64x8xbf16, #tpu.memory_space<vmem>>, %arg7: memref<1x8xf32, #tpu.memory_space<vmem>>, %arg8: memref<16x8xf32, #tpu.memory_space<vmem>>) attributes {dimension_semantics = [#tpu.dimension_semantics<parallel>], iteration_bounds = array<i64: 1>, scalar_prefetch = 0 : i64, scratch_operands = 0 : i64, tpu.core_type = #tpu.core_type<tc>, window_params = [{transform_indices = @transform_0, window_bounds = array<i64: 16, 32>}, {pipeline_mode = #tpu.pipeline_mode<synchronous>, transform_indices = @transform_1, window_bounds = array<i64: 32, 64>}, {pipeline_mode = #tpu.pipeline_mode<synchronous>, transform_indices = @transform_2, window_bounds = array<i64: 1, 64>}, {pipeline_mode = #tpu.pipeline_mode<synchronous>, transform_indices = @transform_3, window_bounds = array<i64: 64, 64>}, {pipeline_mode = #tpu.pipeline_mode<synchronous>, transform_indices = @transform_4, window_bounds = array<i64: 1, 64>}, {pipeline_mode = #tpu.pipeline_mode<synchronous>, transform_indices = @transform_5, window_bounds = array<i64: 64, 8>}, {pipeline_mode = #tpu.pipeline_mode<synchronous>, transform_indices = @transform_6, window_bounds = array<i64: 1, 8>}, {transform_indices = @transform_7, window_bounds = array<i64: 16, 8>}]} {
    %c0 = arith.constant 0 : index
    %c0_0 = arith.constant 0 : index
    %0 = vector.load %arg1[%c0, %c0_0] : memref<16x32xf32, #tpu.memory_space<vmem>>, vector<16x32xf32>
    %1 = arith.truncf %0 : vector<16x32xf32> to vector<16x32xbf16>
    %c0_1 = arith.constant 0 : index
    %c0_2 = arith.constant 0 : index
    %2 = vector.load %arg2[%c0_1, %c0_2] : memref<32x64xbf16, #tpu.memory_space<vmem>>, vector<32x64xbf16>
    %cst = arith.constant dense<0.000000e+00> : vector<16x64xf32>
    %3 = tpu.matmul %1, %2, %cst {dimension_numbers = #tpu.dot_dimension_numbers<[1], [0], [0], [1], [0, 0, 1, 1], [], []>} : vector<16x32xbf16>, vector<32x64xbf16>, vector<16x64xf32> -> vector<16x64xf32>
    %c0_3 = arith.constant 0 : index
    %c0_4 = arith.constant 0 : index
    %4 = vector.load %arg3[%c0_3, %c0_4] : memref<1x64xf32, #tpu.memory_space<vmem>>, vector<1x64xf32>
    %5 = vector.broadcast %4 : vector<1x64xf32> to vector<16x64xf32>
    %6 = arith.addf %3, %5 : vector<16x64xf32>
    %cst_5 = arith.constant 0.00999999977 : f32
    %7 = vector.broadcast %cst_5 : f32 to vector<16x64xf32>
    %8 = arith.mulf %7, %6 : vector<16x64xf32>
    %9 = arith.maximumf %6, %8 : vector<16x64xf32>
    %10 = arith.truncf %9 : vector<16x64xf32> to vector<16x64xbf16>
    %c0_6 = arith.constant 0 : index
    %c0_7 = arith.constant 0 : index
    %11 = vector.load %arg4[%c0_6, %c0_7] : memref<64x64xbf16, #tpu.memory_space<vmem>>, vector<64x64xbf16>
    %cst_8 = arith.constant dense<0.000000e+00> : vector<16x64xf32>
    %12 = tpu.matmul %10, %11, %cst_8 {dimension_numbers = #tpu.dot_dimension_numbers<[1], [0], [0], [1], [0, 0, 1, 1], [], []>} : vector<16x64xbf16>, vector<64x64xbf16>, vector<16x64xf32> -> vector<16x64xf32>
    %c0_9 = arith.constant 0 : index
    %c0_10 = arith.constant 0 : index
    %13 = vector.load %arg5[%c0_9, %c0_10] : memref<1x64xf32, #tpu.memory_space<vmem>>, vector<1x64xf32>
    %14 = vector.broadcast %13 : vector<1x64xf32> to vector<16x64xf32>
    %15 = arith.addf %12, %14 : vector<16x64xf32>
    %cst_11 = arith.constant 0.00999999977 : f32
    %16 = vector.broadcast %cst_11 : f32 to vector<16x64xf32>
    %17 = arith.mulf %16, %15 : vector<16x64xf32>
    %18 = arith.maximumf %15, %17 : vector<16x64xf32>
    %19 = arith.truncf %18 : vector<16x64xf32> to vector<16x64xbf16>
    %c0_12 = arith.constant 0 : index
    %c0_13 = arith.constant 0 : index
    %20 = vector.load %arg6[%c0_12, %c0_13] : memref<64x8xbf16, #tpu.memory_space<vmem>>, vector<64x8xbf16>
    %cst_14 = arith.constant dense<0.000000e+00> : vector<16x8xf32>
    %21 = tpu.matmul %19, %20, %cst_14 {dimension_numbers = #tpu.dot_dimension_numbers<[1], [0], [0], [1], [0, 0, 1, 1], [], []>} : vector<16x64xbf16>, vector<64x8xbf16>, vector<16x8xf32> -> vector<16x8xf32>
    %c0_15 = arith.constant 0 : index
    %c0_16 = arith.constant 0 : index
    %22 = vector.load %arg7[%c0_15, %c0_16] : memref<1x8xf32, #tpu.memory_space<vmem>>, vector<1x8xf32>
    %23 = vector.broadcast %22 : vector<1x8xf32> to vector<16x8xf32>
    %24 = arith.addf %21, %23 : vector<16x8xf32>
    %c0_17 = arith.constant 0 : index
    %c0_18 = arith.constant 0 : index
    %25 = vector.load %arg8[%c0_17, %c0_18] : memref<16x8xf32, #tpu.memory_space<vmem>>, vector<16x8xf32>
    tpu.vector_store %arg8[%c0_17, %c0_18], %24 {strides = array<i32>} : memref<16x8xf32, #tpu.memory_space<vmem>>, vector<16x8xf32>,
    return
  }
  func.func @transform_0(%arg0: i32) -> (i32, i32) {
    %c0_i32 = arith.constant 0 : i32
    %c0_i32_0 = arith.constant 0 : i32
    return %arg0, %c0_i32 : i32, i32
  }
  func.func @transform_1(%arg0: i32) -> (i32, i32) {
    %c0_i32 = arith.constant 0 : i32
    %c0_i32_0 = arith.constant 0 : i32
    %c0_i32_1 = arith.constant 0 : i32
    return %c0_i32, %c0_i32_0 : i32, i32
  }
  func.func @transform_2(%arg0: i32) -> (i32, i32) {
    %c0_i32 = arith.constant 0 : i32
    %c0_i32_0 = arith.constant 0 : i32
    %c0_i32_1 = arith.constant 0 : i32
    return %c0_i32, %c0_i32_0 : i32, i32
  }
  func.func @transform_3(%arg0: i32) -> (i32, i32) {
    %c0_i32 = arith.constant 0 : i32
    %c0_i32_0 = arith.constant 0 : i32
    %c0_i32_1 = arith.constant 0 : i32
    return %c0_i32, %c0_i32_0 : i32, i32
  }
  func.func @transform_4(%arg0: i32) -> (i32, i32) {
    %c0_i32 = arith.constant 0 : i32
    %c0_i32_0 = arith.constant 0 : i32
    %c0_i32_1 = arith.constant 0 : i32
    return %c0_i32, %c0_i32_0 : i32, i32
  }
  func.func @transform_5(%arg0: i32) -> (i32, i32) {
    %c0_i32 = arith.constant 0 : i32
    %c0_i32_0 = arith.constant 0 : i32
    %c0_i32_1 = arith.constant 0 : i32
    return %c0_i32, %c0_i32_0 : i32, i32
  }
  func.func @transform_6(%arg0: i32) -> (i32, i32) {
    %c0_i32 = arith.constant 0 : i32
    %c0_i32_0 = arith.constant 0 : i32
    %c0_i32_1 = arith.constant 0 : i32
    return %c0_i32, %c0_i32_0 : i32, i32
  }
  func.func @transform_7(%arg0: i32) -> (i32, i32) {
    %c0_i32 = arith.constant 0 : i32
    %c0_i32_0 = arith.constant 0 : i32
    return %arg0, %c0_i32 : i32, i32
  }
}

</mosaic_0001>

<bundles_post_ra>
// kernel: tpu_custom_call.1
= control target key start
LH: loop header
LB: loop body
LE: loop exit
PB: predicated region body
PF: predicated region fallthrough
CT: control target
= control target key end

     0   :  { %12 = vsyncpa [#allocation3], 0  ;;  %s555_s0 = inlined_call_operand.hbm [shape: f32[16,32], index: 0, kind: input, shape index: {}]   ;;  %s556_s1 = inlined_call_operand.hbm [shape: bf16[32,64], index: 1, kind: input, shape index: {}]   ;;  %s557_s2 = inlined_call_operand.vmem [shape: f32[1,64], index: 2, kind: input, shape index: {}]   ;;  %s558_s3 = inlined_call_operand.vmem [shape: bf16[64,64], index: 3, kind: input, shape index: {}]   ;;  %s559_s4 = inlined_call_operand.vmem [shape: f32[1,64], index: 4, kind: input, shape index: {}]   ;;  %s560_s5 = inlined_call_operand.vmem [shape: bf16[64,8], index: 5, kind: input, shape index: {}]   ;;  %s561_s6 = inlined_call_operand.vmem [shape: f32[1,8], index: 6, kind: input, shape index: {}]   ;;  %s562_s7 = inlined_call_operand.vmem [shape: f32[16,8], index: 7, kind: output, shape index: {}]  }
   0x1   :  { %13 = vsyncpa [#allocation5], 0  ;;  %s439_s24 = smov [#allocation2]   ;;  %s391_s28 = scalar_lea.hbm %s555_s0, 256 }
   0x2   :  { %s19_s25 = sshll.u32 %s439_s24, 4  ;;  %p392_p0 = scmp.ne.s32.totalorder %s555_s0, %s391_s28  ;;  %s20_s25 = int_to_ptr.vmem [resolvable:$true] %s19_s25 }
   0x3   :  { %p395_p1 = scmp.lt.u32.totalorder %s391_s28, %s555_s0 }
   0x5   :  { %p397_p2 = pnand %p395_p1, %p392_p0 }
   0x7   :  { %400 = shalt.err (!%p397_p2)
}
   0x8   :  { %s401_s10 = scalar_lea.vmem %s20_s25, 256  ;;  %p406_p4 = scmp.lt.s32.totalorder %s20_s25, %s20_s25 }
   0x9   :  { %p402_p3 = scmp.ne.s32.totalorder %s20_s25, %s401_s10  ;;  %p407_p5 = scmp.lt.s32.totalorder %s401_s10, %s401_s10 }
   0xb   :  { %p408_p6 = por %p407_p5, %p406_p4 }
   0xd   :  { %p409_p7 = pnand %p408_p6, %p402_p3 }
   0xf   :  { %412 = shalt.err (!%p409_p7)
}
  0x10   :  { %s440_s11 = smov 128   ;;  %s441_s12 = smov 8  }
  0x11   :  { %25 = dma.hbm_to_vmem [thread:$0]  %s555_s0, 256, %s20_s25, [#allocation3], %s440_s11, %s440_s11, %s441_s12  }
  0x12   :  { %s442_s15 = smov [#allocation4]   ;;  %s413_s19 = scalar_lea.hbm %s556_s1, 256 }
  0x13   :  { %s31_s16 = sshll.u32 %s442_s15, 4  ;;  %p414_p8 = scmp.ne.s32.totalorder %s556_s1, %s413_s19  ;;  %s32_s16 = int_to_ptr.vmem [resolvable:$true] %s31_s16 }
  0x14   :  { %p417_p9 = scmp.lt.u32.totalorder %s413_s19, %s556_s1 }
  0x16   :  { %p419_p10 = pnand %p417_p9, %p414_p8 }
  0x18   :  { %422 = shalt.err (!%p419_p10)
}
  0x19   :  { %s423_s24 = scalar_lea.vmem %s32_s16, 256  ;;  %p428_p12 = scmp.lt.s32.totalorder %s32_s16, %s32_s16 }
  0x1a   :  { %p424_p11 = scmp.ne.s32.totalorder %s32_s16, %s423_s24  ;;  %p429_p13 = scmp.lt.s32.totalorder %s423_s24, %s423_s24 }
  0x1c   :  { %p430_p0 = por %p429_p13, %p428_p12 }
  0x1e   :  { %p431_p1 = pnand %p430_p0, %p424_p11 }
  0x20   :  { %434 = shalt.err (!%p431_p1)
}
  0x21   :  { %s443_s0 = smov 64   ;;  %s444_s25 = smov 4  }
  0x22   :  { %37 = dma.hbm_to_vmem [thread:$0]  %s556_s1, 256, %s32_s16, [#allocation5], %s443_s0, %s443_s0, %s444_s25  }
  0x23   :  { %435 = dma.done.wait [#allocation3], 256  }
  0x24   :  { %436 = vsyncadd [#allocation3], 4294967040 }
  0x25   :  { %437 = dma.done.wait [#allocation5], 256  }
  0x26   :  { %438 = vsyncadd [#allocation5], 4294967040  ;;  %v445_v0 = vmov 0.0   ;;  %vm446_vm0 = vmmov 0   ;;  %v381_v1 = vld [vmem:[#allocation4] sm:$0xff]   ;;  %v382_v2 = vld [vmem:[#allocation4 + $0x8] sm:$0xff]  }
  0x27   :  { %341 = vmatprep.subr.bf16.mxu0 %v445_v0  ;;  %345 = vmatprep.mubr.msk.bf16.mxu0 %vm446_vm0, %v445_v0  ;;  %v55_v3 = vld [vmem:[#allocation2] sm:$0xff]  ;;  %v56_v4 = vld [vmem:[#allocation2 + $0x8] sm:$0xff]  ;;  %vm81_vm1 = vcmask 261120   ;;  %v385_v8 = vld [vmem:[%s558_s3 + $0x10] sm:$0xff]   ;;  %vm170_vm2 = vcmask 523264   ;;  %vm303_vm3 = vcmask 64512  }
  0x28   :  { %349 = vmatprep.subr.bf16.mxu1 %v445_v0  ;;  %357 = vmatprep.mubr.msk.bf16.mxu1 %vm446_vm0, %v445_v0  ;;  %v383_v5 = vld [vmem:[%s558_s3] sm:$0xff]   ;;  %v57_v6 = vpack.c.bf16 %v56_v4, %v55_v3  ;;  %v384_v7 = vld [vmem:[%s558_s3 + $0x8] sm:$0xff]   ;;  %v386_v9 = vld [vmem:[%s558_s3 + $0x18] sm:$0xff]  }
  0x29   :  { %342 = vmatpush3.bf16.msra.mxu0 %v381_v1  ;;  %350 = vmatpush3.bf16.msra.mxu1 %v383_v5  ;;  %v387_v10 = vld [vmem:[%s560_s5] sm:$0xff]   ;;  %v388_v23 = vld [vmem:[%s560_s5 + $0x8] sm:$0xff]   ;;  %v389_v24 = vld [vmem:[%s560_s5 + $0x10] sm:$0xff]  }
  0x2a   :  { %343 = vmatprep.subr.bf16.mxu0 %v445_v0  ;;  %351 = vmatprep.subr.bf16.mxu1 %v445_v0  ;;  %v312_v11 = vld [vmem:[%s557_s2] ss:$0 sm:$0xff]  ;;  %v390_v25 = vld [vmem:[%s560_s5 + $0x18] sm:$0xff]  }
  0x2b   :  { %v316_v26 = vld [vmem:[%s559_s4] ss:$0 sm:$0xff] }
  0x2c   :  { %v322_v38 = vld [vmem:[%s561_s6] ss:$0 sm:$0xff] }
  0x2d   :  { %344 = vmatpush3.bf16.msra.mxu0 %v382_v2  ;;  %352 = vmatpush3.bf16.msra.mxu1 %v384_v7 }
  0x2e   :  { %361 = vmatprep.subr.bf16.mxu0 %v445_v0  ;;  %353 = vmatprep.subr.bf16.mxu1 %v445_v0 }
  0x30   :  { %346 = vmatmul.mubr.msk.bf16.vlgmr.msra.gmra.mrb[0].mxu0 %vm81_vm1, %v57_v6 }
  0x31   :  { %369 = vmatprep.mubr.msk.bf16.mxu0 %vm446_vm0, %v445_v0  ;;  %354 = vmatpush3.bf16.msra.mxu1 %v385_v8 }
  0x32   :  { %355 = vmatprep.subr.bf16.mxu1 %v445_v0  ;;  %362 = vmatpush3.bf16.msra.mxu0 %v387_v10 }
  0x33   :  { %363 = vmatprep.subr.bf16.mxu0 %v445_v0 }
  0x35   :  { %356 = vmatpush3.bf16.msra.mxu1 %v386_v9 }
  0x36   :  { %364 = vmatpush3.bf16.msra.mxu0 %v388_v23 }
  0x37   :  { %365 = vmatprep.subr.bf16.mxu0 %v445_v0 }
  0x3a   :  { %366 = vmatpush3.bf16.msra.mxu0 %v389_v24 }
  0x3b   :  { %367 = vmatprep.subr.bf16.mxu0 %v445_v0 }
  0x3e   :  { %368 = vmatpush3.bf16.msra.mxu0 %v390_v25 }
 0x103   :  { %v119_v12 = vpop.f32.mrb[0].mxu0 }
 0x104   :  { %v120_v13 = vadd.f32 %v312_v11, %v119_v12  ;;  %v347_v14 = vpop.f32.mrb[1].mxu0 }
 0x105   :  { %v122_v15 = vpop.f32.mrb[2].mxu0 }
 0x106   :  { %v126_v16 = vmul.f32 0.01, %v120_v13  ;;  %v123_v17 = vadd.f32 %v312_v11, %v122_v15  ;;  %v348_v18 = vpop.f32.mrb[3].mxu0 }
 0x108   :  { %v127_v19 = vmul.f32 0.01, %v123_v17  ;;  %v128_v20 = vmax.f32 %v120_v13, %v126_v16 }
 0x10a   :  { %v129_v21 = vmax.f32 %v123_v17, %v127_v19 }
 0x10c   :  { %v130_v22 = vpack.c.bf16 %v129_v21, %v128_v20 }
 0x10e   :  { %358 = vmatmul.mubr.msk.bf16.vlgmr.msra.gmra.mrb[0].mxu1 %vm170_vm2, %v130_v22 }
 0x1e1   :  { %v208_v27 = vpop.f32.mrb[0].mxu1 }
 0x1e2   :  { %v209_v28 = vadd.f32 %v316_v26, %v208_v27  ;;  %v359_v29 = vpop.f32.mrb[1].mxu1 }
 0x1e3   :  { %v211_v30 = vpop.f32.mrb[2].mxu1 }
 0x1e4   :  { %v215_v31 = vmul.f32 0.01, %v209_v28  ;;  %v212_v32 = vadd.f32 %v316_v26, %v211_v30  ;;  %v360_v33 = vpop.f32.mrb[3].mxu1 }
 0x1e6   :  { %v216_v34 = vmul.f32 0.01, %v212_v32  ;;  %v217_v35 = vmax.f32 %v209_v28, %v215_v31 }
 0x1e8   :  { %v218_v36 = vmax.f32 %v212_v32, %v216_v34 }
 0x1ea   :  { %v219_v37 = vpack.c.bf16 %v218_v36, %v217_v35 }
 0x1ec   :  { %370 = vmatmul.mubr.msk.bf16.vlgmr.msra.gmra.mrb[4].mxu0 %vm170_vm2, %v219_v37 }
 0x2bf   :  { %v296_v39 = vpop.f32.mrb[4].mxu0 }
 0x2c0   :  { %v297_v40 = vadd.f32 %v322_v38, %v296_v39  ;;  %v371_v41 = vpop.f32.mrb[5].mxu0 }
 0x2c1   :  { %v299_v42 = vpop.f32.mrb[6].mxu0 }
 0x2c2   :  { %304 = vst.msk [vmem:[%s562_s7] sm:$0xff] %vm303_vm3, %v297_v40  ;;  %v300_v43 = vadd.f32 %v322_v38, %v299_v42  ;;  %v372_v44 = vpop.f32.mrb[7].mxu0 }
 0x2c4   :  { %305 = vst.msk [vmem:[%s562_s7 + $0x8] sm:$0xff] %vm303_vm3, %v300_v43 }
 0x2c5   :  { %310 = vsyncpa [#allocation3], 1 }
 0x2c6   :  { %311 = vsyncpa [#allocation5], 1 }

</bundles_post_ra>
